<compile_context>
chip_gen: v7x
topology: tpu7x:2x2x1
jax: 0.10.0
libtpu: 0.0.40
codegen_flags: <defaults>
</compile_context>

<pallas_src>
import math

import jax
import jax.numpy as jnp
from jax.experimental import pallas as pl
from jax.experimental.pallas import tpu as pltpu

# VMEM accounting: budget for our buffers (conservative for v7x's 64 MiB
# physical per TensorCore) and the scoped limit requested from Mosaic
# (above the 16/32 MiB scoped defaults, well under every chip's physical VMEM).
_VMEM_BUDGET_BYTES = 24 * 1024 * 1024
_VMEM_LIMIT_BYTES = 48 * 1024 * 1024


def fold_encoder_attention_kernel(x_ref, wqkv_ref, bqkv_ref, o_ref):
    tb, s, f = x_ref.shape
    r = tb * s

    # (TB, S, F) -> (TB*S, F): minor dim unchanged (free), fills the MXU M dim.
    x2 = x_ref[...].reshape(r, f)

    # Fused QKV projection: one (TB*S, F) @ (F, 3F) matmul, f32 accumulation.
    qkv = jnp.dot(x2, wqkv_ref[...], preferred_element_type=jnp.float32)
    qkv = qkv + bqkv_ref[...]                                  # (TB*S, 3F) f32

    # NOTE: for F < 128 these slices are lane-shifted views inside one (8,128)
    # tile (small XLU cost); padding each projection to a 128-lane boundary
    # would make them free but is not worth it at these sizes.
    q = qkv[:, :f]
    k = qkv[:, f:2 * f]
    v = qkv[:, 2 * f:]

    # scores[b, s] = sum_f q*k / sqrt(F)        (lane reduce -> XLU)
    scale = jnp.float32(1.0 / math.sqrt(f))
    s3 = (jnp.sum(q * k, axis=-1, keepdims=True) * scale).reshape(tb, s, 1)

    # Softmax over the sequence axis, per batch element, in f32.
    m = jnp.max(s3, axis=1, keepdims=True)                     # (TB, 1, 1)
    e = jnp.exp(s3 - m)                                        # (TB, S, 1)
    denom = jnp.sum(e, axis=1, keepdims=True)                  # (TB, 1, 1)
    inv = pl.reciprocal(denom, approx=True)                    # EUP vrcp
    inv = inv * (2.0 - denom * inv)                            # 1 NR step -> ~f32 exact
    w3 = e * inv                                               # (TB, S, 1)

    # out[b, f] = sum_s w[b,s] * v[b,s,f] — sublane reduce on the idle XLU.
    out = jnp.sum(v.reshape(tb, s, f) * w3, axis=1)            # (TB, F) f32
    o_ref[...] = out.astype(o_ref.dtype)


def _choose_block_b(batch, seq, feat, itemsize):
    """Pick TB = batch elements per grid step."""
    # 1) Fill ~2048 rows of the (TB*S, F) matmul per step: big tiles keep the
    #    HBM stream near roofline and amortize the ~0.35 us per-step overhead.
    tb = max(1, 2048 // max(seq, 1))

    # 2) Keep the grid length >= 2 when the batch allows it so the 'parallel'
    #    batch axis can shard across v7x's two TensorCores (harmless on v5e/v6e).
    if batch >= 16:
        tb = min(tb, pl.cdiv(batch, 2))

    # 3) Alignment BEFORE the VMEM check: an output block that does not span
    #    the whole (padded) batch needs a sublane-aligned (mult-of-8) lead dim.
    if tb >= batch:
        tb = batch
    else:
        tb = ((tb + 7) // 8) * 8

    # 4) VMEM budget: double-buffered x / out blocks, resident QKV weight+bias,
    #    and the in-kernel (TB*S, 3F) f32 qkv intermediate plus q/k/v/weighted
    #    temporaries.  Lane dims < 128 are padded in VMEM/vregs.
    lane_f = max(feat, 128)
    lane_3f = max(3 * feat, 128)

    def vmem_bytes(t):
        x_blk = 2 * t * seq * lane_f * itemsize          # double-buffered input
        out_blk = 2 * t * lane_f * 4                     # double-buffered output
        w_res = 2 * (feat * lane_3f * itemsize + lane_3f * 4)
        qkv = t * seq * lane_3f * 4                      # f32 intermediate
        temps = 4 * t * seq * lane_f * 4                 # q, k, v, weighted
        return x_blk + out_blk + w_res + qkv + temps

    while tb > 8 and vmem_bytes(tb) > _VMEM_BUDGET_BYTES:
        new_tb = max(8, (tb // 2) // 8 * 8)
        if new_tb == tb:
            break
        tb = new_tb
    return tb


def fold_encoder_attention(encoded, wq, bq, wk, bk, wv, bv, *,
                           block_b=None, compute_dtype=None):
    """encoded: (B, S, F).  w*: (F, F) PyTorch layout (out, in).  b*: (F,).

    compute_dtype: optional dtype (e.g. jnp.bfloat16) for the x stream and the
    fused QKV weight; halves HBM traffic / uses native bf16 MXU rate.  The
    accumulation, softmax and reduction stay f32.  This is a precision change
    relative to the f32 PyTorch module, so it is opt-in (default: keep input
    precision).
    """
    batch, seq, feat = encoded.shape
    out_dtype = encoded.dtype
    mm_dtype = jnp.dtype(compute_dtype) if compute_dtype is not None \
        else jnp.dtype(encoded.dtype)

    # Fuse Q/K/V params: pre-transpose to (F_in, F_out) and concatenate along
    # the output dim -> one (F, 3F) weight (matmul dtype) and one (1, 3F) f32 bias.
    w_qkv = jnp.concatenate([wq.T, wk.T, wv.T], axis=1).astype(mm_dtype)
    b_qkv = jnp.concatenate([bq, bk, bv]).reshape(1, 3 * feat).astype(jnp.float32)

    x = encoded.astype(mm_dtype)

    tb = block_b if block_b is not None else _choose_block_b(
        batch, seq, feat, mm_dtype.itemsize)

    # Pad the batch to a multiple of TB; padded rows are zeros, their outputs
    # are well defined (softmax of equal scores is uniform) and sliced off.
    batch_p = pl.cdiv(batch, tb) * tb
    if batch_p != batch:
        x = jnp.pad(x, ((0, batch_p - batch), (0, 0), (0, 0)))

    grid = (batch_p // tb,)
    out = pl.pallas_call(
        fold_encoder_attention_kernel,
        out_shape=jax.ShapeDtypeStruct((batch_p, feat), out_dtype),
        grid_spec=pltpu.PrefetchScalarGridSpec(
            num_scalar_prefetch=0,
            grid=grid,
            in_specs=[
                pl.BlockSpec((tb, seq, feat), lambda i: (i, 0, 0)),   # x tile
                pl.BlockSpec((feat, 3 * feat), lambda i: (0, 0)),     # W_qkv (resident)
                pl.BlockSpec((1, 3 * feat), lambda i: (0, 0)),        # b_qkv (resident)
            ],
            out_specs=pl.BlockSpec((tb, feat), lambda i: (i, 0)),
        ),
        compiler_params=pltpu.CompilerParams(
            dimension_semantics=("parallel",),
            vmem_limit_bytes=_VMEM_LIMIT_BYTES),
    )(x, w_qkv, b_qkv)

    # NOTE: for F < 128 the (TB, F) output block stores are lane-masked; the
    # output stream is only 1/S of the input traffic, so packing 128//F batch
    # rows per output row was intentionally skipped for simplicity.
    return out[:batch]


def _reference(encoded, wq, bq, wk, bk, wv, bv):
    q = jnp.einsum("bsf,gf->bsg", encoded, wq) + bq
    k = jnp.einsum("bsf,gf->bsg", encoded, wk) + bk
    v = jnp.einsum("bsf,gf->bsg", encoded, wv) + bv
    scores = jnp.einsum("bsf,bsf->bs", q, k) / jnp.sqrt(
        jnp.float32(encoded.shape[-1]))
    weights = jax.nn.softmax(scores, axis=1)
    return jnp.einsum("bsf,bs->bf", v, weights)


if __name__ == "__main__":
    S, F = 8, 32

    key = jax.random.PRNGKey(0)
    k_x, k_wq, k_bq, k_wk, k_bk, k_wv, k_bv, k_x2 = jax.random.split(key, 8)

    # PyTorch-layout parameters: (out_features, in_features) weights, (F,) bias.
    wq = jax.random.normal(k_wq, (F, F), dtype=jnp.float32) * 0.1
    bq = jax.random.normal(k_bq, (F,), dtype=jnp.float32) * 0.1
    wk = jax.random.normal(k_wk, (F, F), dtype=jnp.float32) * 0.1
    bk = jax.random.normal(k_bk, (F,), dtype=jnp.float32) * 0.1
    wv = jax.random.normal(k_wv, (F, F), dtype=jnp.float32) * 0.1
    bv = jax.random.normal(k_bv, (F,), dtype=jnp.float32) * 0.1

    # Case 1: module-spec small shape (B=2) — single block covers the batch.
    B = 2
    encoded = jax.random.normal(k_x, (B, S, F), dtype=jnp.float32)
    out = jax.block_until_ready(
        fold_encoder_attention(encoded, wq, bq, wk, bk, wv, bv))
    ref = _reference(encoded, wq, bq, wk, bk, wv, bv)
    assert out.shape == (B, F)
    assert jnp.allclose(out, ref, atol=1e-4, rtol=1e-4), (
        "case1 mismatch vs reference: "
        f"max abs err = {float(jnp.max(jnp.abs(out - ref)))}")

    # Case 2: multi-step grid + batch padding path (B=40 -> TB=24, padded
    # batch 48, grid=(2,) so the parallel axis can shard on v7x's 2 TCs).
    B2 = 40
    encoded2 = jax.random.normal(k_x2, (B2, S, F), dtype=jnp.float32)
    out2 = jax.block_until_ready(
        fold_encoder_attention(encoded2, wq, bq, wk, bk, wv, bv))
    ref2 = _reference(encoded2, wq, bq, wk, bk, wv, bv)
    assert out2.shape == (B2, F)
    assert jnp.allclose(out2, ref2, atol=1e-4, rtol=1e-4), (
        "case2 mismatch vs reference: "
        f"max abs err = {float(jnp.max(jnp.abs(out2 - ref2)))}")

    # Case 3: opt-in bf16 x / W_qkv stream (f32 accumulation + softmax);
    # looser tolerance reflects the intentional precision change.
    out3 = jax.block_until_ready(
        fold_encoder_attention(encoded2, wq, bq, wk, bk, wv, bv,
                               compute_dtype=jnp.bfloat16))
    assert out3.shape == (B2, F)
    assert jnp.allclose(out3, ref2, atol=5e-2, rtol=5e-2), (
        "case3 (bf16) mismatch vs reference: "
        f"max abs err = {float(jnp.max(jnp.abs(out3 - ref2)))}")

    print("KERNEL_OK")
</pallas_src>

<mosaic_0001>
module attributes {stable_mosaic.version = 11 : i64} {
  func.func @fold_encoder_attention_kernel(%arg0: i32, %arg1: memref<2x8x32xf32, #tpu.memory_space<vmem>>, %arg2: memref<32x96xf32, #tpu.memory_space<vmem>>, %arg3: memref<1x96xf32, #tpu.memory_space<vmem>>, %arg4: memref<2x32xf32, #tpu.memory_space<vmem>>) attributes {dimension_semantics = [#tpu.dimension_semantics<parallel>], iteration_bounds = array<i64: 1>, scalar_prefetch = 0 : i64, scratch_operands = 0 : i64, tpu.core_type = #tpu.core_type<tc>, window_params = [{transform_indices = @transform_0, window_bounds = array<i64: 2, 8, 32>}, {pipeline_mode = #tpu.pipeline_mode<synchronous>, transform_indices = @transform_1, window_bounds = array<i64: 32, 96>}, {pipeline_mode = #tpu.pipeline_mode<synchronous>, transform_indices = @transform_2, window_bounds = array<i64: 1, 96>}, {transform_indices = @transform_3, window_bounds = array<i64: 2, 32>}]} {
    %c0 = arith.constant 0 : index
    %c0_0 = arith.constant 0 : index
    %c0_1 = arith.constant 0 : index
    %0 = vector.load %arg1[%c0, %c0_0, %c0_1] : memref<2x8x32xf32, #tpu.memory_space<vmem>>, vector<2x8x32xf32>
    %1 = vector.shape_cast %0 : vector<2x8x32xf32> to vector<16x32xf32>
    %c0_2 = arith.constant 0 : index
    %c0_3 = arith.constant 0 : index
    %2 = vector.load %arg2[%c0_2, %c0_3] : memref<32x96xf32, #tpu.memory_space<vmem>>, vector<32x96xf32>
    %cst = arith.constant dense<0.000000e+00> : vector<16x96xf32>
    %3 = tpu.matmul %1, %2, %cst {dimension_numbers = #tpu.dot_dimension_numbers<[1], [0], [0], [1], [0, 0, 1, 1], [], []>} : vector<16x32xf32>, vector<32x96xf32>, vector<16x96xf32> -> vector<16x96xf32>
    %c0_4 = arith.constant 0 : index
    %c0_5 = arith.constant 0 : index
    %4 = vector.load %arg3[%c0_4, %c0_5] : memref<1x96xf32, #tpu.memory_space<vmem>>, vector<1x96xf32>
    %5 = vector.broadcast %4 : vector<1x96xf32> to vector<16x96xf32>
    %6 = arith.addf %3, %5 : vector<16x96xf32>
    %7 = vector.extract_strided_slice %6 {offsets = [0, 0], sizes = [16, 32], strides = [1, 1]} : vector<16x96xf32> to vector<16x32xf32>
    %8 = vector.extract_strided_slice %6 {offsets = [0, 32], sizes = [16, 32], strides = [1, 1]} : vector<16x96xf32> to vector<16x32xf32>
    %9 = vector.extract_strided_slice %6 {offsets = [0, 64], sizes = [16, 32], strides = [1, 1]} : vector<16x96xf32> to vector<16x32xf32>
    %10 = arith.mulf %7, %8 : vector<16x32xf32>
    %cst_6 = arith.constant dense<0.000000e+00> : vector<16xf32>
    %11 = vector.multi_reduction <add>, %10, %cst_6 [1] : vector<16x32xf32> to vector<16xf32>
    %12 = vector.shape_cast %11 : vector<16xf32> to vector<16x1xf32>
    %cst_7 = arith.constant 0.176776692 : f32
    %13 = vector.broadcast %cst_7 : f32 to vector<16x1xf32>
    %14 = arith.mulf %12, %13 : vector<16x1xf32>
    %15 = vector.shape_cast %14 : vector<16x1xf32> to vector<2x8x1xf32>
    %cst_8 = arith.constant dense<0xFF800000> : vector<2x1xf32>
    %16 = vector.multi_reduction <maximumf>, %15, %cst_8 [1] : vector<2x8x1xf32> to vector<2x1xf32>
    %17 = vector.shape_cast %16 : vector<2x1xf32> to vector<2x1x1xf32>
    %18 = vector.broadcast %17 : vector<2x1x1xf32> to vector<2x8x1xf32>
    %19 = arith.subf %15, %18 : vector<2x8x1xf32>
    %20 = math.exp %19 : vector<2x8x1xf32>
    %cst_9 = arith.constant dense<0.000000e+00> : vector<2x1xf32>
    %21 = vector.multi_reduction <add>, %20, %cst_9 [1] : vector<2x8x1xf32> to vector<2x1xf32>
    %22 = vector.shape_cast %21 : vector<2x1xf32> to vector<2x1x1xf32>
    %23 = tpu.reciprocal %22 {approx = true} : vector<2x1x1xf32> -> vector<2x1x1xf32>
    %24 = arith.mulf %22, %23 : vector<2x1x1xf32>
    %cst_10 = arith.constant 2.000000e+00 : f32
    %25 = vector.broadcast %cst_10 : f32 to vector<2x1x1xf32>
    %26 = arith.subf %25, %24 : vector<2x1x1xf32>
    %27 = arith.mulf %23, %26 : vector<2x1x1xf32>
    %28 = vector.broadcast %27 : vector<2x1x1xf32> to vector<2x8x1xf32>
    %29 = arith.mulf %20, %28 : vector<2x8x1xf32>
    %30 = vector.shape_cast %9 : vector<16x32xf32> to vector<2x8x32xf32>
    %31 = vector.broadcast %29 : vector<2x8x1xf32> to vector<2x8x32xf32>
    %32 = arith.mulf %30, %31 : vector<2x8x32xf32>
    %cst_11 = arith.constant dense<0.000000e+00> : vector<2x32xf32>
    %33 = vector.multi_reduction <add>, %32, %cst_11 [1] : vector<2x8x32xf32> to vector<2x32xf32>
    %c0_12 = arith.constant 0 : index
    %c0_13 = arith.constant 0 : index
    %34 = vector.load %arg4[%c0_12, %c0_13] : memref<2x32xf32, #tpu.memory_space<vmem>>, vector<2x32xf32>
    tpu.vector_store %arg4[%c0_12, %c0_13], %33 {strides = array<i32>} : memref<2x32xf32, #tpu.memory_space<vmem>>, vector<2x32xf32>,
    return
  }
  func.func @transform_0(%arg0: i32) -> (i32, i32, i32) {
    %c0_i32 = arith.constant 0 : i32
    %c0_i32_0 = arith.constant 0 : i32
    %c0_i32_1 = arith.constant 0 : i32
    return %arg0, %c0_i32, %c0_i32_0 : i32, i32, i32
  }
  func.func @transform_1(%arg0: i32) -> (i32, i32) {
    %c0_i32 = arith.constant 0 : i32
    %c0_i32_0 = arith.constant 0 : i32
    %c0_i32_1 = arith.constant 0 : i32
    return %c0_i32, %c0_i32_0 : i32, i32
  }
  func.func @transform_2(%arg0: i32) -> (i32, i32) {
    %c0_i32 = arith.constant 0 : i32
    %c0_i32_0 = arith.constant 0 : i32
    %c0_i32_1 = arith.constant 0 : i32
    return %c0_i32, %c0_i32_0 : i32, i32
  }
  func.func @transform_3(%arg0: i32) -> (i32, i32) {
    %c0_i32 = arith.constant 0 : i32
    %c0_i32_0 = arith.constant 0 : i32
    return %arg0, %c0_i32 : i32, i32
  }
}

</mosaic_0001>

<bundles_post_ra>
// kernel: tpu_custom_call.1
= control target key start
LH: loop header
LB: loop body
LE: loop exit
PB: predicated region body
PF: predicated region fallthrough
CT: control target
= control target key end

     0   :  { %8 = vsyncpa [#allocation3], 0  ;;  %s423_s0 = inlined_call_operand.hbm [shape: f32[2,8,32], index: 0, kind: input, shape index: {}]   ;;  %s424_s1 = inlined_call_operand.hbm [shape: f32[32,96], index: 1, kind: input, shape index: {}]   ;;  %s425_s2 = inlined_call_operand.vmem [shape: f32[1,96], index: 2, kind: input, shape index: {}]   ;;  %s426_s3 = inlined_call_operand.hbm [shape: f32[2,32], index: 3, kind: output, shape index: {}]  }
   0x1   :  { %9 = vsyncpa [#allocation6], 0 }
   0x2   :  { %10 = vsyncpa [#allocation4], 0  ;;  %s353_s12 = smov [#allocation2]   ;;  %s281_s16 = scalar_lea.hbm %s423_s0, 256 }
   0x3   :  { %s16_s13 = sshll.u32 %s353_s12, 4  ;;  %p282_p0 = scmp.ne.s32.totalorder %s423_s0, %s281_s16  ;;  %s17_s13 = int_to_ptr.vmem [resolvable:$true] %s16_s13 }
   0x4   :  { %p285_p1 = scmp.lt.u32.totalorder %s281_s16, %s423_s0 }
   0x6   :  { %p287_p2 = pnand %p285_p1, %p282_p0 }
   0x8   :  { %290 = shalt.err (!%p287_p2)
}
   0x9   :  { %s291_s21 = scalar_lea.vmem %s17_s13, 256  ;;  %p296_p4 = scmp.lt.s32.totalorder %s17_s13, %s17_s13 }
   0xa   :  { %p292_p3 = scmp.ne.s32.totalorder %s17_s13, %s291_s21  ;;  %p297_p5 = scmp.lt.s32.totalorder %s291_s21, %s291_s21 }
   0xc   :  { %p298_p6 = por %p297_p5, %p296_p4 }
   0xe   :  { %p299_p7 = pnand %p298_p6, %p292_p3 }
  0x10   :  { %302 = shalt.err (!%p299_p7)
}
  0x11   :  { %s354_s22 = smov 128   ;;  %s355_s23 = smov 8  }
  0x12   :  { %22 = dma.hbm_to_vmem [thread:$0]  %s423_s0, 256, %s17_s13, [#allocation3], %s354_s22, %s354_s22, %s355_s23  }
  0x13   :  { %s356_s26 = smov [#allocation5]   ;;  %s303_s30 = scalar_lea.hbm %s424_s1, 512 }
  0x14   :  { %s28_s27 = sshll.u32 %s356_s26, 4  ;;  %p304_p8 = scmp.ne.s32.totalorder %s424_s1, %s303_s30  ;;  %s29_s27 = int_to_ptr.vmem [resolvable:$true] %s28_s27 }
  0x15   :  { %p307_p9 = scmp.lt.u32.totalorder %s303_s30, %s424_s1 }
  0x17   :  { %p309_p10 = pnand %p307_p9, %p304_p8 }
  0x19   :  { %312 = shalt.err (!%p309_p10)
}
  0x1a   :  { %s313_s8 = scalar_lea.vmem %s29_s27, 512  ;;  %p318_p12 = scmp.lt.s32.totalorder %s29_s27, %s29_s27 }
  0x1b   :  { %p314_p11 = scmp.ne.s32.totalorder %s29_s27, %s313_s8  ;;  %p319_p13 = scmp.lt.s32.totalorder %s313_s8, %s313_s8 }
  0x1d   :  { %p320_p0 = por %p319_p13, %p318_p12 }
  0x1f   :  { %p321_p1 = pnand %p320_p0, %p314_p11 }
  0x21   :  { %324 = shalt.err (!%p321_p1)
}
  0x22   :  { %34 = dma.hbm_to_vmem [thread:$0]  %s424_s1, 512, %s29_s27, [#allocation6], %s354_s22, %s354_s22, %s355_s23  }
  0x23   :  { %347 = dma.done.wait [#allocation3], 256  }
  0x24   :  { %348 = vsyncadd [#allocation3], 4294967040 }
  0x25   :  { %349 = dma.done.wait [#allocation6], 512  }
  0x26   :  { %350 = vsyncadd [#allocation6], 4294966784  ;;  %vm56_vm0 = vcmask 261120   ;;  %v45_v0 = vld [vmem:[#allocation5] sm:$0xff]  ;;  %v46_v1 = vld [vmem:[#allocation5 + $0x8] sm:$0xff]  ;;  %s357_s11 = smov 96  }
  0x27   :  { %v47_v2 = vld [vmem:[#allocation5 + $0x10] sm:$0xff]  ;;  %v258_v3 = vpack.c.bf16 %v46_v1, %v45_v0  ;;  %v48_v4 = vld [vmem:[#allocation5 + $0x18] sm:$0xff]  ;;  %vm198_vm1 = vcmask 785920   ;;  %vm215_vm2 = vcmask 1041409   ;;  %s359_s12 = smov [#allocation7]   ;;  %vm220_vm3 = vcmask 254976  }
  0x28   :  { %v43_v5 = vld [vmem:[#allocation2] sm:$0xff]  ;;  %v262_v6 = vpack.c.bf16 %v48_v4, %v47_v2  ;;  %v44_v7 = vld [vmem:[#allocation2 + $0x8] sm:$0xff]  ;;  %s228_s13 = sshll.u32 %s359_s12, 4  ;;  %s229_s13 = int_to_ptr.vmem [resolvable:$true] %s228_s13 }
  0x29   :  { %255 = vmatprep.mubr.msk.f32.mxu0 %vm56_vm0, %v43_v5  ;;  %259 = vmatprep.subr.bf16.mxu0 %v258_v3  ;;  %v238_v8 = vld [vmem:[%s425_s2] ss:$0 sm:$0xff]  ;;  %s358_s2 = smov 64   ;;  %s325_s14 = scalar_lea.vmem %s229_s13, 32 }
  0x2a   :  { %261 = vmatpush3.bf16.msra.mxu0 %v258_v3  ;;  %p326_p2 = scmp.ne.s32.totalorder %s229_s13, %s325_s14  ;;  %p330_p3 = scmp.lt.s32.totalorder %s229_s13, %s229_s13 }
  0x2b   :  { %263 = vmatprep.subr.bf16.mxu0 %v262_v6  ;;  %p331_p4 = scmp.lt.s32.totalorder %s325_s14, %s325_s14 }
  0x2d   :  { %p332_p5 = por %p331_p4, %p330_p3 }
  0x2e   :  { %265 = vmatpush3.bf16.msra.mxu0 %v262_v6 }
  0x2f   :  { %p333_p6 = pnand %p332_p5, %p326_p2 }
  0x31   :  { %256 = vmatmul.mubr.msk.f32.vlgmr.msra.gmra.mrb[0].mxu0 %vm56_vm0, %v44_v7 }
 0x104   :  { %v257_v9 = vpop.f32.mrb[0].mxu0 }
 0x105   :  { %v129_v10 = vpop.f32.mrb[1].mxu0  ;;  %v135_v12 = vadd.f32 %v257_v9, %v238_v8 }
 0x106   :  { %v130_v11 = vadd.f32 %v238_v8, %v129_v10 }
 0x108   :  { %140 = vrot.lane.b32.xlu0 %v130_v11, %s357_s11 }
 0x10c   :  { %142 = vrot.lane.b32.xlu0 %v135_v12, %s357_s11 }
 0x17a   :  { %v141_v13 = vpop.permute.xlu0 %140 }
 0x17b   :  { %v146_v14 = vmul.f32 %v141_v13, %v130_v11 }
 0x17d   :  { %v148_v15 = vsel %vm56_vm0, %v146_v14, 0.0 }
 0x17e   :  { %149 = vadd.xlane.f32.xlu1 %v148_v15  ;;  %v143_v16 = vpop.permute.xlu0 %142 }
 0x17f   :  { %v147_v17 = vmul.f32 %v143_v16, %v135_v12 }
 0x181   :  { %v151_v18 = vsel %vm56_vm0, %v147_v17, 0.0 }
 0x182   :  { %152 = vadd.xlane.f32.xlu1 %v151_v18 }
 0x20b   :  { %v150_v19 = vpop.xlane.xlu1 %149 }
 0x20c   :  { %v154_v20 = vmul.f32 0.17677669, %v150_v19 }
 0x20e   :  { %v156_v21 = vrot.slane %v154_v20, 4 }
 0x20f   :  { %v153_v22 = vpop.xlane.xlu1 %152 }
 0x210   :  { %v157_v23 = vmax.f32 %v154_v20, %v156_v21  ;;  %v155_v24 = vmul.f32 0.17677669, %v153_v22 }
 0x212   :  { %v158_v25 = vrot.slane %v157_v23, 2  ;;  %v162_v26 = vrot.slane %v155_v24, 4 }
 0x214   :  { %v159_v27 = vmax.f32 %v157_v23, %v158_v25  ;;  %v163_v28 = vmax.f32 %v155_v24, %v162_v26 }
 0x216   :  { %v160_v29 = vrot.slane %v159_v27, 1  ;;  %v164_v30 = vrot.slane %v163_v28, 2 }
 0x218   :  { %v161_v31 = vmax.f32 %v159_v27, %v160_v29  ;;  %v165_v32 = vmax.f32 %v163_v28, %v164_v30 }
 0x21a   :  { %v168_v33 = vsub.f32 %v154_v20, %v161_v31  ;;  %v166_v34 = vrot.slane %v165_v32, 1 }
 0x21c   :  { %v170_v35 = vmul.f32 1.442695, %v168_v33  ;;  %v167_v36 = vmax.f32 %v165_v32, %v166_v34 }
 0x21e   :  { %273 = vpow2.f32 %v170_v35  ;;  %v169_v37 = vsub.f32 %v155_v24, %v167_v36 }
 0x220   :  { %v172_v38 = vmul.f32 1.442695, %v169_v37 }
 0x222   :  { %275 = vpow2.f32 %v172_v38 }
 0x228   :  { %v274_v39 = vpop.eup %273 }
 0x229   :  { %v174_v40 = vrot.slane %v274_v39, 4 }
 0x22b   :  { %v175_v41 = vadd.f32 %v274_v39, %v174_v40 }
 0x22c   :  { %v276_v42 = vpop.eup %275 }
 0x22d   :  { %v176_v43 = vrot.slane %v175_v41, 2  ;;  %v180_v44 = vrot.slane %v276_v42, 4 }
 0x22f   :  { %v177_v45 = vadd.f32 %v176_v43, %v175_v41  ;;  %v181_v46 = vadd.f32 %v276_v42, %v180_v44 }
 0x231   :  { %v178_v47 = vrot.slane %v177_v45, 1  ;;  %v182_v48 = vrot.slane %v181_v46, 2 }
 0x233   :  { %v179_v49 = vadd.f32 %v178_v47, %v177_v45  ;;  %v183_v50 = vadd.f32 %v182_v48, %v181_v46 }
 0x235   :  { %v184_v51 = vrot.slane %v183_v50, 1  ;;  %277 = vrcp.f32 %v179_v49 }
 0x237   :  { %v185_v52 = vadd.f32 %v184_v51, %v183_v50 }
 0x239   :  { %279 = vrcp.f32 %v185_v52 }
 0x23f   :  { %v278_v53 = vpop.eup %277 }
 0x240   :  { %v188_v54 = vmul.f32 %v278_v53, %v179_v49 }
 0x242   :  { %v190_v55 = vsub.f32 2.0, %v188_v54 }
 0x243   :  { %v280_v56 = vpop.eup %279 }
 0x244   :  { %v189_v57 = vmul.f32 %v280_v56, %v185_v52  ;;  %v192_v58 = vmul.f32 %v278_v53, %v190_v55 }
 0x246   :  { %v191_v59 = vsub.f32 2.0, %v189_v57  ;;  %v194_v60 = vmul.f32 %v274_v39, %v192_v58 }
 0x248   :  { %v193_v61 = vmul.f32 %v280_v56, %v191_v59  ;;  %v196_v62 = vmul.f32 %v194_v60, %v130_v11 }
 0x24a   :  { %v195_v63 = vmul.f32 %v276_v42, %v193_v61  ;;  %v199_v0 = vsel %vm198_vm1, %v196_v62, 0.0 }
 0x24b   :  { %v200_v1 = vrot.slane %v199_v0, 4 }
 0x24c   :  { %v197_v2 = vmul.f32 %v195_v63, %v135_v12 }
 0x24d   :  { %v201_v3 = vadd.f32 %v200_v1, %v199_v0 }
 0x24e   :  { %v206_v4 = vsel %vm198_vm1, %v197_v2, 0.0 }
 0x24f   :  { %v202_v5 = vrot.slane %v201_v3, 2  ;;  %v207_v6 = vrot.slane %v206_v4, 4 }
 0x251   :  { %v203_v7 = vadd.f32 %v202_v5, %v201_v3  ;;  %v208_v8 = vadd.f32 %v207_v6, %v206_v4 }
 0x253   :  { %v209_v9 = vrot.slane %v208_v8, 2  ;;  %v204_v10 = vrot.slane %v203_v7, 1 }
 0x255   :  { %v210_v13 = vadd.f32 %v209_v9, %v208_v8  ;;  %v205_v15 = vadd.f32 %v204_v10, %v203_v7 }
 0x257   :  { %v211_v14 = vrot.slane %v210_v13, 1 }
 0x259   :  { %v212_v16 = vadd.f32 %v211_v14, %v210_v13 }
 0x25b   :  { %v216_v17 = vsel %vm215_vm2, %v212_v16, %v205_v15 }
 0x25c   :  { %217 = vrot.lane.b32.xlu0 %v216_v17, %s358_s2 }
 0x2ce   :  { %v218_v11 = vpop.permute.xlu0 %217 }
 0x2cf   :  { %221 = vst.msk [vmem:[#allocation7] sm:$0x3] %vm220_vm3, %v218_v11 }
 0x2d0   :  { %336 = shalt.err (!%p333_p6)
}
 0x2d1   :  { %s337_s17 = scalar_lea.hbm %s426_s3, 32 }
 0x2d2   :  { %p338_p7 = scmp.ne.s32.totalorder %s426_s3, %s337_s17  ;;  %p341_p8 = scmp.lt.u32.totalorder %s337_s17, %s426_s3 }
 0x2d4   :  { %p343_p9 = pnand %p341_p8, %p338_p7 }
 0x2d6   :  { %346 = shalt.err (!%p343_p9)
}
 0x2d7   :  { %231 = dma.vmem_to_hbm [thread:$0]  %s229_s13, 32, %s426_s3, [#allocation4]  }
 0x2d8   :  { %351 = dma.done.wait [#allocation4], 32  }
 0x2d9   :  { %352 = vsyncadd [#allocation4], 4294967264 }
 0x2da   :  { %235 = vsyncpa [#allocation3], 1 }
 0x2db   :  { %236 = vsyncpa [#allocation6], 1 }
 0x2dc   :  { %237 = vsyncpa [#allocation4], 1 }

</bundles_post_ra>
